<compile_context>
chip_gen: v7x
topology: tpu7x:2x2x1
jax: 0.10.0
libtpu: 0.0.40
codegen_flags: <defaults>
</compile_context>

<pallas_src>
import jax
import jax.numpy as jnp
from jax.experimental import pallas as pl
from jax.experimental.pallas import tpu as pltpu

BN_EPS = 1e-5


def _make_ffn_kernel(chunk, n_chunks):
    """Kernel over one batch tile of packed rows.

    xp_ref : (tile_rows, R*D)  packed input rows (lane-dense when R*D == 128)
    w1p_ref: (R*D, R*H)        block-diag fc1 weight, VMEM-resident
    b1p_ref: (1, R*H)          fc1 bias tiled R times
    w2p_ref: (R*H, R)          block-diag fc2 weight (eval-mode BN folded in)
    b2_ref : (1, 1) SMEM       fc2 bias (eval-mode BN folded in)
    o_ref  : (tile_rows, R)    packed output rows
    """

    def kernel(xp_ref, w1p_ref, b1p_ref, w2p_ref, b2_ref, o_ref):
        b2 = b2_ref[0, 0]

        def compute_chunk(r0):
            x = xp_ref[pl.ds(r0, chunk), :]
            # fc1 (MXU, f32 accumulate) + bias + ReLU
            h = jnp.dot(x, w1p_ref[...], preferred_element_type=jnp.float32)
            h = jnp.maximum(h + b1p_ref[...], 0.0)
            # BatchNorm (eval) folded into w2p/b2; Dropout identity in eval.
            # fc2 as a second (slack) MXU matmul against block-diagonal w2p:
            # keeps batch on sublanes, no cross-lane relayout needed.
            out = jnp.dot(h, w2p_ref[...], preferred_element_type=jnp.float32)
            o_ref[pl.ds(r0, chunk), :] = out + b2

        if n_chunks == 1:
            compute_chunk(0)
        else:
            def body(c, carry):
                compute_chunk(pl.multiple_of(c * chunk, chunk))
                return carry
            jax.lax.fori_loop(0, n_chunks, body, 0)

    return kernel


def _pick_tiles(rows):
    """Returns (tile_rows, chunk).

    tile_rows = packed rows DMA'd per grid step (>=2 steps once rows >= 16, so
    both v7x TensorCores get work; multiple of 8 for the sublane rule).
    chunk     = packed rows per in-kernel matmul (bounds live intermediates);
                always divides tile_rows.
    """
    if rows < 16:
        return rows, rows
    if rows <= 1024:
        tr = max(8, min(rows, ((rows + 15) // 16) * 8))      # ~rows/2, mult of 8
        return tr, tr
    tr = min(4096, ((rows + 2047) // 2048) * 1024)           # ~rows/2, mult of 1024
    return tr, 1024


def single_layer_ffn(x, params):
    """x: (B, input_dim) f32.  Returns (B,) f32 (output_dim == 1, squeezed)."""
    B, D = x.shape
    w1, b1, gamma, beta, mean, var, w2, b2 = params
    H = w1.shape[1]
    assert w2.shape[1] == 1, "kernel specialized to output_dim == 1 (squeeze(-1))"

    # ---- Fold eval-mode BatchNorm into fc2 (exact: BN-after-ReLU is affine) --
    a = gamma * jax.lax.rsqrt(var + BN_EPS)          # (1, H)
    c = beta - mean * a                              # (1, H)
    w2_eff = a.reshape(H, 1) * w2                    # (H, 1)
    b2_eff = (c @ w2 + b2).reshape(1, 1)             # (1, 1)

    # ---- Pack R input rows per kernel row (free contiguous reshape) ---------
    R = 1
    if D <= 128 and 128 % D == 0 and B % (128 // D) == 0:
        R = 128 // D
    rows = B // R
    DP = R * D
    xp = x.reshape(rows, DP)                          # row-major merge: no copy

    eye_r = jnp.eye(R, dtype=x.dtype)
    w1p = jnp.kron(eye_r, w1)                         # (DP, R*H) block-diagonal
    b1p = jnp.tile(b1.reshape(1, H), (1, R))          # (1, R*H)
    w2p = jnp.kron(eye_r, w2_eff)                     # (R*H, R) block-diagonal

    tile_rows, chunk = _pick_tiles(rows)
    n_chunks = tile_rows // chunk
    grid = (pl.cdiv(rows, tile_rows),)

    cost = pl.CostEstimate(
        flops=2 * rows * DP * (R * H) + 2 * rows * (R * H) * R,
        transcendentals=0,
        bytes_accessed=4 * (rows * DP + rows * R
                            + DP * R * H + R * H + R * H * R + 1),
    )

    out = pl.pallas_call(
        _make_ffn_kernel(chunk, n_chunks),
        out_shape=jax.ShapeDtypeStruct((rows, R), jnp.float32),
        grid=grid,
        in_specs=[
            pl.BlockSpec((tile_rows, DP), lambda i: (i, 0)),     # x (streamed)
            pl.BlockSpec((DP, R * H), lambda i: (0, 0)),         # w1p (resident)
            pl.BlockSpec((1, R * H), lambda i: (0, 0)),          # b1p (resident)
            pl.BlockSpec((R * H, R), lambda i: (0, 0)),          # w2p (resident)
            pl.BlockSpec(memory_space=pltpu.MemorySpace.SMEM),   # b2 scalar
        ],
        out_specs=pl.BlockSpec((tile_rows, R), lambda i: (i, 0)),
        compiler_params=pltpu.CompilerParams(
            dimension_semantics=("parallel",),
            vmem_limit_bytes=32 * 1024 * 1024,
        ),
        cost_estimate=cost,
    )(xp, w1p, b1p, w2p, b2_eff)

    # squeeze(-1): output_dim == 1 -> (B,)
    return out.reshape(-1)[:B]


def init_params(key, input_dim, hidden_dim=64, output_dim=1):
    """Deterministic synthetic parameters matching the PyTorch module shapes."""
    k1, k2, k3, k4, k5, k6, k7 = jax.random.split(key, 7)
    # nn.Linear(input_dim, hidden_dim): weight stored transposed as (in, hidden)
    w1 = jax.random.normal(k1, (input_dim, hidden_dim), jnp.float32) * 0.1
    b1 = jax.random.normal(k2, (1, hidden_dim), jnp.float32) * 0.1
    # BatchNorm1d(hidden_dim)
    gamma = 1.0 + 0.1 * jax.random.normal(k3, (1, hidden_dim), jnp.float32)
    beta = 0.1 * jax.random.normal(k4, (1, hidden_dim), jnp.float32)
    mean = 0.1 * jax.random.normal(k5, (1, hidden_dim), jnp.float32)
    var = jnp.abs(1.0 + 0.1 * jax.random.normal(k6, (1, hidden_dim), jnp.float32))
    # nn.Linear(hidden_dim, output_dim)
    w2 = jax.random.normal(k7, (hidden_dim, output_dim), jnp.float32) * 0.1
    b2 = jnp.zeros((1, output_dim), jnp.float32)
    return (w1, b1, gamma, beta, mean, var, w2, b2)


def reference(x, params):
    w1, b1, gamma, beta, mean, var, w2, b2 = params
    h = jnp.maximum(x @ w1 + b1, 0.0)
    h = (h - mean) / jnp.sqrt(var + BN_EPS) * gamma + beta
    out = h @ w2 + b2
    return out[:, 0]


if __name__ == "__main__":
    B, INPUT_DIM, HIDDEN_DIM, OUTPUT_DIM = 8, 16, 64, 1

    key = jax.random.PRNGKey(0)
    kx, kp = jax.random.split(key)
    x = jax.random.normal(kx, (B, INPUT_DIM), jnp.float32)
    params = init_params(kp, INPUT_DIM, HIDDEN_DIM, OUTPUT_DIM)

    y = single_layer_ffn(x, params)
    jax.block_until_ready(y)

    y_ref = reference(x, params)
    assert y.shape == (B,), y.shape
    assert jnp.allclose(y, y_ref, atol=1e-4, rtol=1e-4), (y, y_ref)
    print("KERNEL_OK")
</pallas_src>

<mosaic_0001>
module attributes {stable_mosaic.version = 11 : i64} {
  func.func @kernel(%arg0: i32, %arg1: memref<1x128xf32, #tpu.memory_space<vmem>>, %arg2: memref<128x512xf32, #tpu.memory_space<vmem>>, %arg3: memref<1x512xf32, #tpu.memory_space<vmem>>, %arg4: memref<512x8xf32, #tpu.memory_space<vmem>>, %arg5: memref<1x1xf32, #tpu.memory_space<smem>>, %arg6: memref<1x8xf32, #tpu.memory_space<vmem>>) attributes {dimension_semantics = [#tpu.dimension_semantics<parallel>], iteration_bounds = array<i64: 1>, scalar_prefetch = 0 : i64, scratch_operands = 0 : i64, tpu.core_type = #tpu.core_type<tc>, window_params = [{transform_indices = @transform_0, window_bounds = array<i64: 1, 128>}, {pipeline_mode = #tpu.pipeline_mode<synchronous>, transform_indices = @transform_1, window_bounds = array<i64: 128, 512>}, {pipeline_mode = #tpu.pipeline_mode<synchronous>, transform_indices = @transform_2, window_bounds = array<i64: 1, 512>}, {pipeline_mode = #tpu.pipeline_mode<synchronous>, transform_indices = @transform_3, window_bounds = array<i64: 512, 8>}, {transform_indices = @transform_4, window_bounds = array<i64: 1, 1>}, {transform_indices = @transform_5, window_bounds = array<i64: 1, 8>}]} {
    %c0 = arith.constant 0 : index
    %c0_0 = arith.constant 0 : index
    %0 = memref.load %arg5[%c0, %c0_0] : memref<1x1xf32, #tpu.memory_space<smem>>
    %c0_1 = arith.constant 0 : index
    %c0_2 = arith.constant 0 : index
    %1 = vector.load %arg1[%c0_1, %c0_2] : memref<1x128xf32, #tpu.memory_space<vmem>>, vector<1x128xf32>
    %c0_3 = arith.constant 0 : index
    %c0_4 = arith.constant 0 : index
    %2 = vector.load %arg2[%c0_3, %c0_4] : memref<128x512xf32, #tpu.memory_space<vmem>>, vector<128x512xf32>
    %cst = arith.constant dense<0.000000e+00> : vector<1x512xf32>
    %3 = tpu.matmul %1, %2, %cst {dimension_numbers = #tpu.dot_dimension_numbers<[1], [0], [0], [1], [0, 0, 1, 1], [], []>} : vector<1x128xf32>, vector<128x512xf32>, vector<1x512xf32> -> vector<1x512xf32>
    %c0_5 = arith.constant 0 : index
    %c0_6 = arith.constant 0 : index
    %4 = vector.load %arg3[%c0_5, %c0_6] : memref<1x512xf32, #tpu.memory_space<vmem>>, vector<1x512xf32>
    %5 = arith.addf %3, %4 : vector<1x512xf32>
    %cst_7 = arith.constant 0.000000e+00 : f32
    %6 = vector.broadcast %cst_7 : f32 to vector<1x512xf32>
    %7 = arith.maximumf %5, %6 : vector<1x512xf32>
    %c0_8 = arith.constant 0 : index
    %c0_9 = arith.constant 0 : index
    %8 = vector.load %arg4[%c0_8, %c0_9] : memref<512x8xf32, #tpu.memory_space<vmem>>, vector<512x8xf32>
    %cst_10 = arith.constant dense<0.000000e+00> : vector<1x8xf32>
    %9 = tpu.matmul %7, %8, %cst_10 {dimension_numbers = #tpu.dot_dimension_numbers<[1], [0], [0], [1], [0, 0, 1, 1], [], []>} : vector<1x512xf32>, vector<512x8xf32>, vector<1x8xf32> -> vector<1x8xf32>
    %10 = vector.broadcast %0 : f32 to vector<1x8xf32>
    %11 = arith.addf %9, %10 : vector<1x8xf32>
    %c0_11 = arith.constant 0 : index
    %c0_12 = arith.constant 0 : index
    %12 = vector.load %arg6[%c0_11, %c0_12] : memref<1x8xf32, #tpu.memory_space<vmem>>, vector<1x8xf32>
    tpu.vector_store %arg6[%c0_11, %c0_12], %11 {strides = array<i32>} : memref<1x8xf32, #tpu.memory_space<vmem>>, vector<1x8xf32>,
    return
  }
  func.func @transform_0(%arg0: i32) -> (i32, i32) {
    %c0_i32 = arith.constant 0 : i32
    %c0_i32_0 = arith.constant 0 : i32
    return %arg0, %c0_i32 : i32, i32
  }
  func.func @transform_1(%arg0: i32) -> (i32, i32) {
    %c0_i32 = arith.constant 0 : i32
    %c0_i32_0 = arith.constant 0 : i32
    %c0_i32_1 = arith.constant 0 : i32
    return %c0_i32, %c0_i32_0 : i32, i32
  }
  func.func @transform_2(%arg0: i32) -> (i32, i32) {
    %c0_i32 = arith.constant 0 : i32
    %c0_i32_0 = arith.constant 0 : i32
    %c0_i32_1 = arith.constant 0 : i32
    return %c0_i32, %c0_i32_0 : i32, i32
  }
  func.func @transform_3(%arg0: i32) -> (i32, i32) {
    %c0_i32 = arith.constant 0 : i32
    %c0_i32_0 = arith.constant 0 : i32
    %c0_i32_1 = arith.constant 0 : i32
    return %c0_i32, %c0_i32_0 : i32, i32
  }
  func.func @transform_4(%arg0: i32) -> (i32, i32) {
    %c0_i32 = arith.constant 0 : i32
    %c0_i32_0 = arith.constant 0 : i32
    %c0_i32_1 = arith.constant 0 : i32
    return %c0_i32, %c0_i32_0 : i32, i32
  }
  func.func @transform_5(%arg0: i32) -> (i32, i32) {
    %c0_i32 = arith.constant 0 : i32
    %c0_i32_0 = arith.constant 0 : i32
    return %arg0, %c0_i32 : i32, i32
  }
}

</mosaic_0001>

<bundles_post_ra>
// kernel: tpu_custom_call.1
= control target key start
LH: loop header
LB: loop body
LE: loop exit
PB: predicated region body
PF: predicated region fallthrough
CT: control target
= control target key end

     0   :  { %v701_v7 = vmov 0.0   ;;  %s1138_s0 = inlined_call_operand.vmem [shape: f32[1,128], index: 0, kind: input, shape index: {}]   ;;  %s1139_s1 = inlined_call_operand.vmem [shape: f32[128,512], index: 1, kind: input, shape index: {}]   ;;  %s1140_s2 = inlined_call_operand.vmem [shape: f32[1,512], index: 2, kind: input, shape index: {}]   ;;  %s1141_s3 = inlined_call_operand.vmem [shape: f32[512,8], index: 3, kind: input, shape index: {}]   ;;  %s1142_s4 = inlined_call_operand.<no memory space> [shape: f32[1,1], index: 4, kind: input, shape index: {}]   ;;  %s1143_s5 = inlined_call_operand.hbm [shape: f32[1,8], index: 5, kind: output, shape index: {}]  }
   0x1   :  { %v25_v0 = vld [vmem:[%s1139_s1 + $0x8] sm:$0xff]  ;;  %v27_v2 = vld [vmem:[%s1139_s1 + $0x18] sm:$0xff]  ;;  %v24_v5 = vld [vmem:[%s1139_s1] sm:$0xff]  ;;  %174 = vmatprep.mubr.f32.mxu0 %v701_v7  ;;  %245 = vmatprep.mubr.f32.mxu1 %v701_v7 }
   0x2   :  { %v29_v1 = vld [vmem:[%s1139_s1 + $0x28] sm:$0xff]  ;;  %v31_v4 = vld [vmem:[%s1139_s1 + $0x38] sm:$0xff]  ;;  %v28_v6 = vld [vmem:[%s1139_s1 + $0x20] sm:$0xff] }
   0x3   :  { %v547_v3 = vpack.c.bf16 %v29_v1, %v25_v0  ;;  %v579_v8 = vpack.c.bf16 %v31_v4, %v27_v2  ;;  %v549_v9 = vpack.c.bf16 %v28_v6, %v24_v5  ;;  %v26_v10 = vld [vmem:[%s1139_s1 + $0x10] sm:$0xff]  ;;  %v33_v12 = vld [vmem:[%s1139_s1 + $0x48] sm:$0xff]  ;;  %v35_v15 = vld [vmem:[%s1139_s1 + $0x58] sm:$0xff] }
   0x4   :  { %v30_v11 = vld [vmem:[%s1139_s1 + $0x30] sm:$0xff]  ;;  %v37_v14 = vld [vmem:[%s1139_s1 + $0x68] sm:$0xff]  ;;  %v39_v16 = vld [vmem:[%s1139_s1 + $0x78] sm:$0xff] }
   0x5   :  { %548 = vmatprep.subr.bf16.mxu0 %v547_v3  ;;  %v581_v13 = vpack.c.bf16 %v30_v11, %v26_v10  ;;  %580 = vmatprep.subr.bf16.mxu1 %v579_v8  ;;  %v551_v17 = vpack.c.bf16 %v37_v14, %v33_v12  ;;  %v583_v18 = vpack.c.bf16 %v39_v16, %v35_v15  ;;  %v32_v19 = vld [vmem:[%s1139_s1 + $0x40] sm:$0xff]  ;;  %v34_v21 = vld [vmem:[%s1139_s1 + $0x50] sm:$0xff]  ;;  %v41_v24 = vld [vmem:[%s1139_s1 + $0x88] sm:$0xff] }
   0x6   :  { %550 = vmatpush1.bf16.msra.mxu0 %v549_v9  ;;  %v36_v20 = vld [vmem:[%s1139_s1 + $0x60] sm:$0xff]  ;;  %v38_v23 = vld [vmem:[%s1139_s1 + $0x70] sm:$0xff]  ;;  %v45_v25 = vld [vmem:[%s1139_s1 + $0xa8] sm:$0xff] }
   0x7   :  { %582 = vmatpush1.bf16.msra.mxu1 %v581_v13  ;;  %v553_v22 = vpack.c.bf16 %v36_v20, %v32_v19  ;;  %552 = vmatprep.subr.bf16.mxu0 %v551_v17  ;;  %v585_v26 = vpack.c.bf16 %v38_v23, %v34_v21  ;;  %v555_v27 = vpack.c.bf16 %v45_v25, %v41_v24  ;;  %v43_v28 = vld [vmem:[%s1139_s1 + $0x98] sm:$0xff]  ;;  %v40_v30 = vld [vmem:[%s1139_s1 + $0x80] sm:$0xff]  ;;  %v42_v33 = vld [vmem:[%s1139_s1 + $0x90] sm:$0xff] }
   0x8   :  { %584 = vmatprep.subr.bf16.mxu1 %v583_v18  ;;  %v47_v29 = vld [vmem:[%s1139_s1 + $0xb8] sm:$0xff]  ;;  %v44_v32 = vld [vmem:[%s1139_s1 + $0xa0] sm:$0xff]  ;;  %v46_v34 = vld [vmem:[%s1139_s1 + $0xb0] sm:$0xff] }
   0x9   :  { %v587_v31 = vpack.c.bf16 %v47_v29, %v43_v28  ;;  %v557_v35 = vpack.c.bf16 %v44_v32, %v40_v30  ;;  %v49_v36 = vld [vmem:[%s1139_s1 + $0xc8] sm:$0xff]  ;;  %v51_v38 = vld [vmem:[%s1139_s1 + $0xd8] sm:$0xff]  ;;  %v589_v39 = vpack.c.bf16 %v46_v34, %v42_v33  ;;  %v48_v42 = vld [vmem:[%s1139_s1 + $0xc0] sm:$0xff] }
   0xa   :  { %554 = vmatpush1.bf16.msra.mxu0 %v553_v22  ;;  %v53_v37 = vld [vmem:[%s1139_s1 + $0xe8] sm:$0xff]  ;;  %v55_v41 = vld [vmem:[%s1139_s1 + $0xf8] sm:$0xff]  ;;  %v52_v43 = vld [vmem:[%s1139_s1 + $0xe0] sm:$0xff] }
   0xb   :  { %586 = vmatpush1.bf16.msra.mxu1 %v585_v26  ;;  %556 = vmatprep.subr.bf16.mxu0 %v555_v27  ;;  %v559_v40 = vpack.c.bf16 %v53_v37, %v49_v36  ;;  %v591_v44 = vpack.c.bf16 %v55_v41, %v51_v38  ;;  %v50_v45 = vld [vmem:[%s1139_s1 + $0xd0] sm:$0xff]  ;;  %v57_v47 = vld [vmem:[%s1139_s1 + $0x108] sm:$0xff]  ;;  %v59_v49 = vld [vmem:[%s1139_s1 + $0x118] sm:$0xff]  ;;  %v561_v51 = vpack.c.bf16 %v52_v43, %v48_v42 }
   0xc   :  { %588 = vmatprep.subr.bf16.mxu1 %v587_v31  ;;  %v54_v46 = vld [vmem:[%s1139_s1 + $0xf0] sm:$0xff]  ;;  %v61_v48 = vld [vmem:[%s1139_s1 + $0x128] sm:$0xff]  ;;  %v63_v50 = vld [vmem:[%s1139_s1 + $0x138] sm:$0xff] }
   0xd   :  { %v593_v52 = vpack.c.bf16 %v54_v46, %v50_v45  ;;  %v563_v53 = vpack.c.bf16 %v61_v48, %v57_v47  ;;  %v56_v54 = vld [vmem:[%s1139_s1 + $0x100] sm:$0xff]  ;;  %v58_v56 = vld [vmem:[%s1139_s1 + $0x110] sm:$0xff]  ;;  %v595_v57 = vpack.c.bf16 %v63_v50, %v59_v49  ;;  %v65_v59 = vld [vmem:[%s1139_s1 + $0x148] sm:$0xff] }
   0xe   :  { %558 = vmatpush1.bf16.msra.mxu0 %v557_v35  ;;  %v60_v55 = vld [vmem:[%s1139_s1 + $0x120] sm:$0xff]  ;;  %v62_v58 = vld [vmem:[%s1139_s1 + $0x130] sm:$0xff]  ;;  %v69_v60 = vld [vmem:[%s1139_s1 + $0x168] sm:$0xff] }
   0xf   :  { %590 = vmatpush1.bf16.msra.mxu1 %v589_v39  ;;  %560 = vmatprep.subr.bf16.mxu0 %v559_v40  ;;  %v67_v61 = vld [vmem:[%s1139_s1 + $0x158] sm:$0xff]  ;;  %v565_v63 = vpack.c.bf16 %v60_v55, %v56_v54  ;;  %v597_v0 = vpack.c.bf16 %v62_v58, %v58_v56  ;;  %v567_v1 = vpack.c.bf16 %v69_v60, %v65_v59  ;;  %v64_v2 = vld [vmem:[%s1139_s1 + $0x140] sm:$0xff]  ;;  %v66_v4 = vld [vmem:[%s1139_s1 + $0x150] sm:$0xff] }
  0x10   :  { %592 = vmatprep.subr.bf16.mxu1 %v591_v44  ;;  %v71_v62 = vld [vmem:[%s1139_s1 + $0x178] sm:$0xff]  ;;  %v68_v3 = vld [vmem:[%s1139_s1 + $0x160] sm:$0xff]  ;;  %v70_v6 = vld [vmem:[%s1139_s1 + $0x170] sm:$0xff] }
  0x11   :  { %v599_v5 = vpack.c.bf16 %v71_v62, %v67_v61  ;;  %v73_v7 = vld [vmem:[%s1139_s1 + $0x188] sm:$0xff]  ;;  %v75_v9 = vld [vmem:[%s1139_s1 + $0x198] sm:$0xff]  ;;  %v569_v11 = vpack.c.bf16 %v68_v3, %v64_v2  ;;  %v601_v12 = vpack.c.bf16 %v70_v6, %v66_v4  ;;  %v72_v14 = vld [vmem:[%s1139_s1 + $0x180] sm:$0xff] }
  0x12   :  { %562 = vmatpush1.bf16.msra.mxu0 %v561_v51  ;;  %v77_v8 = vld [vmem:[%s1139_s1 + $0x1a8] sm:$0xff]  ;;  %v79_v10 = vld [vmem:[%s1139_s1 + $0x1b8] sm:$0xff]  ;;  %v76_v15 = vld [vmem:[%s1139_s1 + $0x1a0] sm:$0xff] }
  0x13   :  { %594 = vmatpush1.bf16.msra.mxu1 %v593_v52  ;;  %564 = vmatprep.subr.bf16.mxu0 %v563_v53  ;;  %v571_v13 = vpack.c.bf16 %v77_v8, %v73_v7  ;;  %v74_v16 = vld [vmem:[%s1139_s1 + $0x190] sm:$0xff]  ;;  %v603_v17 = vpack.c.bf16 %v79_v10, %v75_v9  ;;  %v81_v19 = vld [vmem:[%s1139_s1 + $0x1c8] sm:$0xff]  ;;  %v83_v21 = vld [vmem:[%s1139_s1 + $0x1d8] sm:$0xff]  ;;  %v573_v23 = vpack.c.bf16 %v76_v15, %v72_v14 }
  0x14   :  { %596 = vmatprep.subr.bf16.mxu1 %v595_v57  ;;  %v78_v18 = vld [vmem:[%s1139_s1 + $0x1b0] sm:$0xff]  ;;  %v85_v20 = vld [vmem:[%s1139_s1 + $0x1e8] sm:$0xff]  ;;  %v87_v22 = vld [vmem:[%s1139_s1 + $0x1f8] sm:$0xff] }
  0x15   :  { %v605_v24 = vpack.c.bf16 %v78_v18, %v74_v16  ;;  %v575_v25 = vpack.c.bf16 %v85_v20, %v81_v19  ;;  %v80_v26 = vld [vmem:[%s1139_s1 + $0x1c0] sm:$0xff]  ;;  %v82_v28 = vld [vmem:[%s1139_s1 + $0x1d0] sm:$0xff]  ;;  %v607_v29 = vpack.c.bf16 %v87_v22, %v83_v21  ;;  %v273_v32 = vld [vmem:[%s1141_s3 + $0x88] sm:$0xff] }
  0x16   :  { %566 = vmatpush1.bf16.msra.mxu0 %v565_v63  ;;  %v84_v27 = vld [vmem:[%s1139_s1 + $0x1e0] sm:$0xff]  ;;  %v86_v30 = vld [vmem:[%s1139_s1 + $0x1f0] sm:$0xff]  ;;  %v305_v34 = vld [vmem:[%s1141_s3 + $0x188] sm:$0xff] }
  0x17   :  { %598 = vmatpush1.bf16.msra.mxu1 %v597_v0  ;;  %568 = vmatprep.subr.bf16.mxu0 %v567_v1  ;;  %v272_v31 = vld [vmem:[%s1141_s3 + $0x80] sm:$0xff]  ;;  %v577_v35 = vpack.c.bf16 %v84_v27, %v80_v26  ;;  %v609_v36 = vpack.c.bf16 %v86_v30, %v82_v28  ;;  %v257_v39 = vld [vmem:[%s1141_s3 + $0x8] sm:$0xff]  ;;  %v274_v43 = vld [vmem:[%s1141_s3 + $0x90] sm:$0xff] }
  0x18   :  { %600 = vmatprep.subr.bf16.mxu1 %v599_v5  ;;  %v304_v33 = vld [vmem:[%s1141_s3 + $0x180] sm:$0xff]  ;;  %v611_v37 = vpack.c.bf16 %v273_v32, %v272_v31  ;;  %v289_v42 = vld [vmem:[%s1141_s3 + $0x108] sm:$0xff]  ;;  %v275_v44 = vld [vmem:[%s1141_s3 + $0x98] sm:$0xff] }
  0x19   :  { %v256_v38 = vld [vmem:[%s1141_s3] sm:$0xff]  ;;  %v643_v41 = vpack.c.bf16 %v305_v34, %v304_v33  ;;  %v306_v45 = vld [vmem:[%s1141_s3 + $0x190] sm:$0xff]  ;;  %v307_v46 = vld [vmem:[%s1141_s3 + $0x198] sm:$0xff]  ;;  %v615_v50 = vpack.c.bf16 %v275_v44, %v274_v43 }
  0x1a   :  { %570 = vmatpush1.bf16.msra.mxu0 %v569_v11  ;;  %v288_v40 = vld [vmem:[%s1141_s3 + $0x100] sm:$0xff]  ;;  %v613_v48 = vpack.c.bf16 %v257_v39, %v256_v38  ;;  %v258_v51 = vld [vmem:[%s1141_s3 + $0x10] sm:$0xff]  ;;  %v259_v52 = vld [vmem:[%s1141_s3 + $0x18] sm:$0xff]  ;;  %v647_v54 = vpack.c.bf16 %v307_v46, %v306_v45 }
  0x1b   :  { %602 = vmatpush1.bf16.msra.mxu1 %v601_v12  ;;  %572 = vmatprep.subr.bf16.mxu0 %v571_v13  ;;  %v23_v47 = vld [vmem:[%s1138_s0] sm:$0x1]  ;;  %v645_v49 = vpack.c.bf16 %v289_v42, %v288_v40  ;;  %v290_v53 = vld [vmem:[%s1141_s3 + $0x110] sm:$0xff]  ;;  %v291_v55 = vld [vmem:[%s1141_s3 + $0x118] sm:$0xff]  ;;  %v617_v60 = vpack.c.bf16 %v259_v52, %v258_v51 }
  0x1c   :  { %604 = vmatprep.subr.bf16.mxu1 %v603_v17  ;;  %v276_v56 = vld [vmem:[%s1141_s3 + $0xa0] sm:$0xff]  ;;  %v277_v57 = vld [vmem:[%s1141_s3 + $0xa8] sm:$0xff]  ;;  %v649_v61 = vpack.c.bf16 %v291_v55, %v290_v53  ;;  %v278_v4 = vld [vmem:[%s1141_s3 + $0xb0] sm:$0xff] }
  0x1d   :  { %v308_v58 = vld [vmem:[%s1141_s3 + $0x1a0] sm:$0xff]  ;;  %v309_v59 = vld [vmem:[%s1141_s3 + $0x1a8] sm:$0xff]  ;;  %v619_v62 = vpack.c.bf16 %v277_v57, %v276_v56  ;;  %v279_v5 = vld [vmem:[%s1141_s3 + $0xb8] sm:$0xff] }
  0x1e   :  { %574 = vmatpush1.bf16.msra.mxu0 %v573_v23  ;;  %v260_v63 = vld [vmem:[%s1141_s3 + $0x20] sm:$0xff]  ;;  %v261_v0 = vld [vmem:[%s1141_s3 + $0x28] sm:$0xff]  ;;  %v651_v2 = vpack.c.bf16 %v309_v59, %v308_v58  ;;  %v310_v6 = vld [vmem:[%s1141_s3 + $0x1b0] sm:$0xff] }
  0x1f   :  { %606 = vmatpush1.bf16.msra.mxu1 %v605_v24  ;;  %576 = vmatprep.subr.bf16.mxu0 %v575_v25  ;;  %v292_v1 = vld [vmem:[%s1141_s3 + $0x120] sm:$0xff]  ;;  %v293_v3 = vld [vmem:[%s1141_s3 + $0x128] sm:$0xff]  ;;  %v311_v7 = vld [vmem:[%s1141_s3 + $0x1b8] sm:$0xff] }
  0x20   :  { %608 = vmatprep.subr.bf16.mxu1 %v607_v29 }
  0x22   :  { %578 = vmatpush1.bf16.msra.mxu0 %v577_v35 }
  0x23   :  { %610 = vmatpush1.bf16.msra.mxu1 %v609_v36  ;;  %612 = vmatprep.subr.bf16.mxu0 %v611_v37 }
  0x24   :  { %644 = vmatprep.subr.bf16.mxu1 %v643_v41 }
  0x25   :  { %175 = vmatmul.mubr.f32.vlgmr.msra.gmra.mrb[0].mxu0 %v23_v47 }
  0x26   :  { %246 = vmatmul.mubr.f32.vlgmr.msra.gmra.mrb[0].mxu1 %v23_v47  ;;  %614 = vmatpush3.bf16.msra.mxu0 %v613_v48 }
  0x27   :  { %646 = vmatpush3.bf16.msra.mxu1 %v645_v49  ;;  %616 = vmatprep.subr.bf16.mxu0 %v615_v50 }
  0x28   :  { %648 = vmatprep.subr.bf16.mxu1 %v647_v54 }
  0x29   :  { %11 = vsyncpa [#allocation4], 0  ;;  %v621_v8 = vpack.c.bf16 %v261_v0, %v260_v63  ;;  %v653_v9 = vpack.c.bf16 %v293_v3, %v292_v1  ;;  %v623_v10 = vpack.c.bf16 %v279_v5, %v278_v4  ;;  %v262_v11 = vld [vmem:[%s1141_s3 + $0x30] sm:$0xff]  ;;  %v263_v12 = vld [vmem:[%s1141_s3 + $0x38] sm:$0xff]  ;;  %v655_v14 = vpack.c.bf16 %v311_v7, %v310_v6  ;;  %s702_s19 = smov [#allocation3]  }
  0x2a   :  { %618 = vmatpush3.bf16.msra.mxu0 %v617_v60  ;;  %v294_v13 = vld [vmem:[%s1141_s3 + $0x130] sm:$0xff]  ;;  %v295_v15 = vld [vmem:[%s1141_s3 + $0x138] sm:$0xff]  ;;  %v280_v16 = vld [vmem:[%s1141_s3 + $0xc0] sm:$0xff]  ;;  %v625_v20 = vpack.c.bf16 %v263_v12, %v262_v11  ;;  %s469_s20 = sshll.u32 %s702_s19, 4  ;;  %vm461_vm0 = vcmask 57344   ;;  %s470_s20 = int_to_ptr.vmem [resolvable:$true] %s469_s20 }
  0x2b   :  { %650 = vmatpush3.bf16.msra.mxu1 %v649_v61  ;;  %620 = vmatprep.subr.bf16.mxu0 %v619_v62  ;;  %v281_v17 = vld [vmem:[%s1141_s3 + $0xc8] sm:$0xff]  ;;  %v312_v18 = vld [vmem:[%s1141_s3 + $0x1c0] sm:$0xff]  ;;  %v657_v21 = vpack.c.bf16 %v295_v15, %v294_v13  ;;  %v282_v28 = vld [vmem:[%s1141_s3 + $0xd0] sm:$0xff]  ;;  %s677_s21 = scalar_lea.vmem %s470_s20, 16  ;;  %s681_s22 = scalar_lea.vmem %s470_s20, 32 }
  0x2c   :  { %652 = vmatprep.subr.bf16.mxu1 %v651_v2  ;;  %v313_v19 = vld [vmem:[%s1141_s3 + $0x1c8] sm:$0xff]  ;;  %v627_v22 = vpack.c.bf16 %v281_v17, %v280_v16  ;;  %v264_v23 = vld [vmem:[%s1141_s3 + $0x40] sm:$0xff]  ;;  %v283_v29 = vld [vmem:[%s1141_s3 + $0xd8] sm:$0xff]  ;;  %v90_v2 = vlaneseq  ;;  %p678_p0 = scmp.ne.s32.totalorder %s470_s20, %s677_s21  ;;  %p682_p1 = scmp.lt.s32.totalorder %s470_s20, %s470_s20 }
  0x2d   :  { %v265_v24 = vld [vmem:[%s1141_s3 + $0x48] sm:$0xff]  ;;  %v296_v25 = vld [vmem:[%s1141_s3 + $0x140] sm:$0xff]  ;;  %v659_v26 = vpack.c.bf16 %v313_v19, %v312_v18  ;;  %v314_v30 = vld [vmem:[%s1141_s3 + $0x1d0] sm:$0xff]  ;;  %v631_v34 = vpack.c.bf16 %v283_v29, %v282_v28  ;;  %p683_p2 = scmp.lt.s32.totalorder %s681_s22, %s677_s21 }
  0x2e   :  { %622 = vmatpush3.bf16.msra.mxu0 %v621_v8  ;;  %v297_v27 = vld [vmem:[%s1141_s3 + $0x148] sm:$0xff]  ;;  %v315_v31 = vld [vmem:[%s1141_s3 + $0x1d8] sm:$0xff]  ;;  %v629_v32 = vpack.c.bf16 %v265_v24, %v264_v23  ;;  %v266_v35 = vld [vmem:[%s1141_s3 + $0x50] sm:$0xff]  ;;  %v91_v3 = vshrl.u32 %v90_v2, 7 }
  0x2f   :  { %654 = vmatpush3.bf16.msra.mxu1 %v653_v9  ;;  %624 = vmatprep.subr.bf16.mxu0 %v623_v10  ;;  %v661_v33 = vpack.c.bf16 %v297_v27, %v296_v25  ;;  %v267_v36 = vld [vmem:[%s1141_s3 + $0x58] sm:$0xff]  ;;  %v298_v37 = vld [vmem:[%s1141_s3 + $0x150] sm:$0xff]  ;;  %v663_v38 = vpack.c.bf16 %v315_v31, %v314_v30  ;;  %v284_v40 = vld [vmem:[%s1141_s3 + $0xe0] sm:$0xff]  ;;  %v320_v27 = vstv %s1142_s4  ;;  %p684_p3 = por %p683_p2, %p682_p1 }
  0x30   :  { %656 = vmatprep.subr.bf16.mxu1 %v655_v14  ;;  %v299_v39 = vld [vmem:[%s1141_s3 + $0x158] sm:$0xff]  ;;  %v285_v41 = vld [vmem:[%s1141_s3 + $0xe8] sm:$0xff]  ;;  %v316_v42 = vld [vmem:[%s1141_s3 + $0x1e0] sm:$0xff]  ;;  %v633_v44 = vpack.c.bf16 %v267_v36, %v266_v35  ;;  %v92_v4 = vsub.s32 0, %v91_v3  ;;  %v100_v6 = vsub.s32 2, %v91_v3  ;;  %v96_v7 = vsub.s32 1, %v91_v3 }
  0x31   :  { %v317_v43 = vld [vmem:[%s1141_s3 + $0x1e8] sm:$0xff]  ;;  %v665_v45 = vpack.c.bf16 %v299_v39, %v298_v37  ;;  %v635_v46 = vpack.c.bf16 %v285_v41, %v284_v40  ;;  %v268_v48 = vld [vmem:[%s1141_s3 + $0x60] sm:$0xff]  ;;  %v286_v54 = vld [vmem:[%s1141_s3 + $0xf0] sm:$0xff]  ;;  %v104_v8 = vsub.s32 3, %v91_v3  ;;  %p685_p4 = pnand %p684_p3, %p678_p0 }
  0x32   :  { %626 = vmatpush3.bf16.msra.mxu0 %v625_v20  ;;  %v667_v47 = vpack.c.bf16 %v317_v43, %v316_v42  ;;  %v269_v49 = vld [vmem:[%s1141_s3 + $0x68] sm:$0xff]  ;;  %v300_v50 = vld [vmem:[%s1141_s3 + $0x160] sm:$0xff]  ;;  %v287_v55 = vld [vmem:[%s1141_s3 + $0xf8] sm:$0xff] }
  0x33   :  { %658 = vmatpush3.bf16.msra.mxu1 %v657_v21  ;;  %628 = vmatprep.subr.bf16.mxu0 %v627_v22  ;;  %v637_v51 = vpack.c.bf16 %v269_v49, %v268_v48  ;;  %v301_v52 = vld [vmem:[%s1141_s3 + $0x168] sm:$0xff]  ;;  %v318_v56 = vld [vmem:[%s1141_s3 + $0x1f0] sm:$0xff]  ;;  %v639_v57 = vpack.c.bf16 %v287_v55, %v286_v54  ;;  %v319_v58 = vld [vmem:[%s1141_s3 + $0x1f8] sm:$0xff] }
  0x34   :  { %660 = vmatprep.subr.bf16.mxu1 %v659_v26  ;;  %v669_v53 = vpack.c.bf16 %v301_v52, %v300_v50  ;;  %v270_v59 = vld [vmem:[%s1141_s3 + $0x70] sm:$0xff]  ;;  %v271_v60 = vld [vmem:[%s1141_s3 + $0x78] sm:$0xff]  ;;  %v671_v61 = vpack.c.bf16 %v319_v58, %v318_v56  ;;  %v88_v5 = vld [vmem:[%s1140_s2] sm:$0xf] }
  0x35   :  { %v641_v62 = vpack.c.bf16 %v271_v60, %v270_v59  ;;  %v302_v63 = vld [vmem:[%s1141_s3 + $0x170] sm:$0xff]  ;;  %v303_v0 = vld [vmem:[%s1141_s3 + $0x178] sm:$0xff]  ;;  %v93_v9 = vrot.slane %v88_v5, %v92_v4  ;;  %v101_v10 = vrot.slane %v88_v5, %v100_v6  ;;  %v97_v11 = vrot.slane %v88_v5, %v96_v7 }
  0x36   :  { %630 = vmatpush3.bf16.msra.mxu0 %v629_v32  ;;  %v673_v1 = vpack.c.bf16 %v303_v0, %v302_v63  ;;  %v105_v12 = vrot.slane %v88_v5, %v104_v8 }
  0x37   :  { %662 = vmatpush3.bf16.msra.mxu1 %v661_v33  ;;  %632 = vmatprep.subr.bf16.mxu0 %v631_v34 }
  0x38   :  { %664 = vmatprep.subr.bf16.mxu1 %v663_v38 }
  0x3a   :  { %634 = vmatpush3.bf16.msra.mxu0 %v633_v44 }
  0x3b   :  { %666 = vmatpush3.bf16.msra.mxu1 %v665_v45  ;;  %636 = vmatprep.subr.bf16.mxu0 %v635_v46 }
  0x3c   :  { %668 = vmatprep.subr.bf16.mxu1 %v667_v47 }
  0x3e   :  { %638 = vmatpush3.bf16.msra.mxu0 %v637_v51 }
  0x3f   :  { %670 = vmatpush3.bf16.msra.mxu1 %v669_v53  ;;  %640 = vmatprep.subr.bf16.mxu0 %v639_v57 }
  0x40   :  { %672 = vmatprep.subr.bf16.mxu1 %v671_v61 }
  0x42   :  { %642 = vmatpush3.bf16.msra.mxu0 %v641_v62 }
  0x43   :  { %674 = vmatpush3.bf16.msra.mxu1 %v673_v1 }
  0xf8   :  { %v176_v13 = vpop.f32.mrb[0].mxu0 }
  0xf9   :  { %v177_v14 = vadd.f32 %v176_v13, %v93_v9  ;;  %v247_v15 = vpop.f32.mrb[0].mxu1  ;;  %v178_v16 = vpop.f32.mrb[1].mxu0 }
  0xfa   :  { %v248_v17 = vadd.f32 %v247_v15, %v101_v10  ;;  %v179_v18 = vadd.f32 %v178_v16, %v97_v11  ;;  %v249_v19 = vpop.f32.mrb[1].mxu1 }
  0xfb   :  { %v250_v20 = vadd.f32 %v249_v19, %v105_v12  ;;  %v252_v23 = vmax.f32 %v177_v14, 0.0 }
  0xfc   :  { %v254_v21 = vmax.f32 %v248_v17, 0.0  ;;  %v253_v22 = vmax.f32 %v179_v18, 0.0 }
  0xfd   :  { %v255_v24 = vmax.f32 %v250_v20, 0.0 }
  0xfe   :  { %385 = vmatprep.mubr.f32.mxu0 %v253_v22 }
  0xff   :  { %455 = vmatprep.mubr.f32.mxu1 %v255_v24  ;;  %386 = vmatmul.mubr.f32.vlgmr.msra.gmra.mrb[2].mxu0 %v252_v23 }
 0x100   :  { %456 = vmatmul.mubr.f32.vlgmr.msra.gmra.mrb[2].mxu1 %v254_v21 }
 0x1d2   :  { %v509_v25 = vpop.f32.mrb[2].mxu0 }
 0x1d3   :  { %v544_v26 = vpop.f32.mrb[2].mxu1  ;;  %v510_v28 = vpop.f32.mrb[3].mxu0 }
 0x1d4   :  { %v511_v29 = vadd.f32 %v510_v28, %v509_v25  ;;  %v545_v30 = vpop.f32.mrb[3].mxu1 }
 0x1d5   :  { %v546_v31 = vadd.f32 %v545_v30, %v544_v26 }
 0x1d6   :  { %v388_v32 = vadd.f32 %v511_v29, %v320_v27 }
 0x1d8   :  { %v458_v33 = vadd.f32 %v546_v31, %v388_v32 }
 0x1da   :  { %462 = vst.msk [vmem:[#allocation3] sm:$0x1] %vm461_vm0, %v458_v33 }
 0x1db   :  { %688 = shalt.err (!%p685_p4)
}
 0x1dc   :  { %s689_s24 = scalar_lea.hbm %s1143_s5, 16 }
 0x1dd   :  { %p690_p5 = scmp.ne.s32.totalorder %s1143_s5, %s689_s24  ;;  %p693_p6 = scmp.lt.u32.totalorder %s689_s24, %s1143_s5 }
 0x1df   :  { %p695_p7 = pnand %p693_p6, %p690_p5 }
 0x1e1   :  { %698 = shalt.err (!%p695_p7)
}
 0x1e2   :  { %472 = dma.vmem_to_hbm [thread:$0]  %s470_s20, 16, %s1143_s5, [#allocation4]  }
 0x1e3   :  { %699 = dma.done.wait [#allocation4], 16  }
 0x1e4   :  { %700 = vsyncadd [#allocation4], 4294967280 }
 0x1e5   :  { %476 = vsyncpa [#allocation4], 1 }

</bundles_post_ra>
